<compile_context>
chip_gen: v6e
topology: v6e:2x2x1
jax: 0.10.0
libtpu: 0.0.40
codegen_flags: <defaults>
</compile_context>

<pallas_src>
import math

import jax
import jax.numpy as jnp
from jax.experimental import pallas as pl
from jax.experimental.pallas import tpu as pltpu


# ----------------------------------------------------------------------------
# Phase 1: hoisted input projection  pre_x = [xr|xi] @ Wx_stack + bias
# ----------------------------------------------------------------------------
def _input_proj_kernel(zx_ref, wx_ref, b_ref, out_ref):
    out_ref[...] = (
        jnp.dot(zx_ref[...], wx_ref[...], preferred_element_type=jnp.float32)
        + b_ref[...]
    )


def _pick_row_block(m, cap):
    """Largest row block <= cap that divides m and is a multiple of 8 (or m)."""
    if m <= cap:
        return m
    for d in range(cap - cap % 8, 7, -8):
        if m % d == 0:
            return d
    return m  # TODO(synk): masked ragged row tiling for awkward T*B


def _input_projection(zx, wx, b, row_block=512):
    """[M, 2I] @ [2I, 8H] + b  ->  [M, 8H] f32, one large-M GEMM."""
    M, K = zx.shape
    N = wx.shape[1]
    tm = _pick_row_block(M, row_block)
    itemsize = jnp.dtype(zx.dtype).itemsize
    cost = pl.CostEstimate(
        flops=int(2 * M * K * N),
        transcendentals=0,
        bytes_accessed=int((M * K + K * N) * itemsize + (M * N + N) * 4),
    )
    return pl.pallas_call(
        _input_proj_kernel,
        out_shape=jax.ShapeDtypeStruct((M, N), jnp.float32),
        grid=(M // tm,),
        in_specs=[
            pl.BlockSpec((tm, K), lambda m: (m, 0)),
            pl.BlockSpec((K, N), lambda m: (0, 0)),   # resident weights
            pl.BlockSpec((1, N), lambda m: (0, 0)),   # resident bias
        ],
        out_specs=pl.BlockSpec((tm, N), lambda m: (m, 0)),
        compiler_params=pltpu.CompilerParams(dimension_semantics=("parallel",)),
        cost_estimate=cost,
    )(zx, wx, b)


# ----------------------------------------------------------------------------
# Phase 2: recurrence — Tb timesteps per grid iteration, state in vregs
# ----------------------------------------------------------------------------
def _complex_lstm_recurrence_kernel(pre_ref, s0_ref, wh_ref, out_ref, state_ref):
    """Grid = (batch blocks, time blocks); time is the inner ("arbitrary") axis.

    pre_ref  : [Tb, Bb, 8H] f32  hoisted input projection (+bias), per block
    s0_ref   : [Bb, 4H]     f32  initial (hr | hi | cr | ci), resident
    wh_ref   : [2H, 8H]     f32  stacked recurrent complex weights, resident
    out_ref  : [Tb, Bb, 4H] f32  packed (ht_re | ht_im | ct_re | ct_im)
    state_ref: [Bb, 4H]     f32  scratch carrying (h, c) across time blocks
    """
    H = out_ref.shape[-1] // 4
    G = 4 * H
    Tb = pre_ref.shape[0]

    @pl.when(pl.program_id(1) == 0)          # first time block of this batch block
    def _():
        state_ref[...] = s0_ref[...]

    def step(t, carry):
        hz, cz = carry                        # [Bb, 2H] each, f32 (vreg-carried)

        # recurrent complex linear (f32 — no per-step quantization drift)
        pre = pre_ref[t] + jnp.dot(hz, wh_ref[...],
                                   preferred_element_type=jnp.float32)  # [Bb, 8H]
        pre_re = pre[:, :G]
        pre_im = pre[:, G:]

        # modSigmoid (lanes < 3H: i, f, o) / modTanh (lanes >= 3H: g)
        mag_sq = pre_re * pre_re + pre_im * pre_im
        inv_mag = jax.lax.rsqrt(mag_sq + 1e-30)      # eps-guard |z| == 0
        mag = mag_sq * inv_mag                        # |z|
        scale_sig = jax.nn.sigmoid(mag) * inv_mag     # sigmoid(|z|)/|z|
        scale_tanh = jnp.tanh(mag) * inv_mag          # tanh(|z|)/|z|
        lane = jax.lax.broadcasted_iota(jnp.int32, mag_sq.shape, 1)
        scale = jnp.where(lane < 3 * H, scale_sig, scale_tanh)
        act_re = pre_re * scale
        act_im = pre_im * scale

        i_re, i_im = act_re[:, :H], act_im[:, :H]
        f_re, f_im = act_re[:, H:2 * H], act_im[:, H:2 * H]
        o_re, o_im = act_re[:, 2 * H:3 * H], act_im[:, 2 * H:3 * H]
        g_re, g_im = act_re[:, 3 * H:], act_im[:, 3 * H:]

        c_re, c_im = cz[:, :H], cz[:, H:]

        # c_t = torch.mul(c, f) + torch.mul(i, g)   (component-wise)
        ct_re = c_re * f_re + i_re * g_re
        ct_im = c_im * f_im + i_im * g_im

        # h_t = o_t (complex multiply) modTanh(c_t)
        mc_sq = ct_re * ct_re + ct_im * ct_im
        inv_mc = jax.lax.rsqrt(mc_sq + 1e-30)
        sc = jnp.tanh(mc_sq * inv_mc) * inv_mc
        tc_re = ct_re * sc
        tc_im = ct_im * sc
        ht_re = o_re * tc_re - o_im * tc_im
        ht_im = o_re * tc_im + o_im * tc_re

        hz_new = jnp.concatenate([ht_re, ht_im], axis=1)
        cz_new = jnp.concatenate([ct_re, ct_im], axis=1)
        out_ref[t] = jnp.concatenate([hz_new, cz_new], axis=1)   # lane-dense store
        return hz_new, cz_new

    hz0 = state_ref[:, :2 * H]
    cz0 = state_ref[:, 2 * H:]
    hz, cz = jax.lax.fori_loop(0, Tb, step, (hz0, cz0), unroll=True)
    state_ref[...] = jnp.concatenate([hz, cz], axis=1)           # carry to next block


# ----------------------------------------------------------------------------
# Weight packing and wrappers
# ----------------------------------------------------------------------------
def _pack_weights(params, input_size, hidden_size, matmul_dtype):
    """Stack complex planes: Wx [2I, 8H] (matmul dtype), Wh [2H, 8H] (f32), bias."""
    wir, wii = params["i2h_wr"].T, params["i2h_wi"].T      # [I, 4H]
    whr, whi = params["h2h_wr"].T, params["h2h_wi"].T      # [H, 4H]
    wx = jnp.concatenate(
        [jnp.concatenate([wir, wii], axis=1),               # xr rows
         jnp.concatenate([-wii, wir], axis=1)], axis=0      # xi rows
    ).astype(matmul_dtype)
    wh = jnp.concatenate(
        [jnp.concatenate([whr, whi], axis=1),               # hr rows
         jnp.concatenate([-whi, whr], axis=1)], axis=0      # hi rows
    ).astype(jnp.float32)                                   # recurrence stays f32
    b = jnp.concatenate(
        [params["i2h_br"] + params["h2h_br"],
         params["i2h_bi"] + params["h2h_bi"]]
    ).reshape(1, 8 * hidden_size).astype(jnp.float32)
    return wx, wh, b


def _largest_divisor(n, cap):
    for d in range(min(n, cap), 0, -1):
        if n % d == 0:
            return d
    return 1


def complex_lstm_sequence(x_seq, h0, c0, params, matmul_dtype=jnp.float32,
                          time_block=16, batch_block=None):
    """Apply the cell over T steps.

    x_seq: [T, B, I, 2]; h0, c0: [B, H, 2].  Returns (h_seq, c_seq): [T, B, H, 2].
    """
    T, B, I, _ = x_seq.shape
    H = h0.shape[1]
    G = 4 * H

    wx, wh, b = _pack_weights(params, I, H, matmul_dtype)

    # Phase 1: hoisted input projection — one large-M GEMM, bias folded in.
    zx = jnp.concatenate([x_seq[..., 0], x_seq[..., 1]], axis=-1)      # [T, B, 2I]
    zx = zx.reshape(T * B, 2 * I).astype(matmul_dtype)
    pre_x = _input_projection(zx, wx, b).reshape(T, B, 2 * G)          # f32

    # Phase 2: recurrence.
    s0 = jnp.concatenate(
        [h0[..., 0], h0[..., 1], c0[..., 0], c0[..., 1]], axis=-1
    ).astype(jnp.float32)                                              # [B, 4H]

    Tb = _largest_divisor(T, time_block)
    Bb = B if batch_block is None else batch_block
    if (B % Bb != 0) or (Bb % 8 != 0 and Bb != B):
        Bb = B
    nb, nt = B // Bb, T // Tb

    cost = pl.CostEstimate(
        flops=int(T * B * (2 * (2 * H) * (2 * G) + 30 * G)),
        transcendentals=int(T * B * (3 * G + 2 * H)),
        bytes_accessed=int((pre_x.size + s0.size + wh.size + T * B * G) * 4),
    )

    # TODO(synk): if profiling shows exposed input DMA for long T, add
    # pipeline_mode=pl.Buffered(3) on the pre_x BlockSpec.
    out = pl.pallas_call(
        _complex_lstm_recurrence_kernel,
        out_shape=jax.ShapeDtypeStruct((T, B, G), jnp.float32),
        grid=(nb, nt),                                    # batch parallel, time serial
        in_specs=[
            pl.BlockSpec((Tb, Bb, 2 * G), lambda bi, ti: (ti, bi, 0)),   # pre_x block
            pl.BlockSpec((Bb, G), lambda bi, ti: (bi, 0)),               # initial state
            pl.BlockSpec((2 * H, 2 * G), lambda bi, ti: (0, 0)),         # resident Wh
        ],
        out_specs=pl.BlockSpec((Tb, Bb, G), lambda bi, ti: (ti, bi, 0)),  # lane-dense 4H
        scratch_shapes=[pltpu.VMEM((Bb, G), jnp.float32)],                # carried (h, c)
        compiler_params=pltpu.CompilerParams(
            dimension_semantics=("parallel", "arbitrary")),
        cost_estimate=cost,
    )(pre_x, s0, wh)

    h_seq = jnp.stack([out[..., :H], out[..., H:2 * H]], axis=-1)
    c_seq = jnp.stack([out[..., 2 * H:3 * H], out[..., 3 * H:]], axis=-1)
    return h_seq, c_seq


def complex_lstm_cell(x, hidden, params, matmul_dtype=jnp.float32):
    """Single-step forward matching _ComplexLSTMcell.forward(x, (h, c))."""
    h, c = hidden
    if (x.ndim != 3) or (h.ndim != 3) or (c.ndim != 3) or (x.shape[-1] != 2) \
            or (h.shape[-1] != 2) or (c.shape[-1] != 2):
        raise ValueError('Input tensor must be size of [batch_size, input_size, 2]')
    h_seq, c_seq = complex_lstm_sequence(x[None], h, c, params, matmul_dtype)
    return h_seq[0], c_seq[0]


def init_params(key, input_size, hidden_size):
    """reset_parameters(): all weights/biases ~ U(-1/sqrt(H), 1/sqrt(H))."""
    std = 1.0 / math.sqrt(hidden_size)
    G = 4 * hidden_size
    names_shapes = [
        ("i2h_wr", (G, input_size)), ("i2h_wi", (G, input_size)),
        ("i2h_br", (G,)), ("i2h_bi", (G,)),
        ("h2h_wr", (G, hidden_size)), ("h2h_wi", (G, hidden_size)),
        ("h2h_br", (G,)), ("h2h_bi", (G,)),
    ]
    keys = jax.random.split(key, len(names_shapes))
    return {
        name: jax.random.uniform(k, shape, jnp.float32, minval=-std, maxval=std)
        for (name, shape), k in zip(names_shapes, keys)
    }


# ----------------------------------------------------------------------------
# Pure-JAX reference (module semantics)
# ----------------------------------------------------------------------------
def _reference_cell(x, h, c, params):
    H = h.shape[1]

    def clin(zr, zi, wr, wi, br, bi):
        return zr @ wr.T - zi @ wi.T + br, zr @ wi.T + zi @ wr.T + bi

    def mod(fn, zr, zi):
        m = jnp.sqrt(zr * zr + zi * zi)
        s = fn(m) / m
        return zr * s, zi * s

    xr, xi = x[..., 0], x[..., 1]
    hr, hi = h[..., 0], h[..., 1]
    cr, ci = c[..., 0], c[..., 1]
    ar, ai = clin(xr, xi, params["i2h_wr"], params["i2h_wi"],
                  params["i2h_br"], params["i2h_bi"])
    br_, bi_ = clin(hr, hi, params["h2h_wr"], params["h2h_wi"],
                    params["h2h_br"], params["h2h_bi"])
    pr, pi = ar + br_, ai + bi_
    sr, si = mod(jax.nn.sigmoid, pr[:, :3 * H], pi[:, :3 * H])
    gr, gi = mod(jnp.tanh, pr[:, 3 * H:], pi[:, 3 * H:])
    ir, ii = sr[:, :H], si[:, :H]
    fr, fi = sr[:, H:2 * H], si[:, H:2 * H]
    or_, oi = sr[:, 2 * H:], si[:, 2 * H:]
    ctr = cr * fr + ir * gr
    cti = ci * fi + ii * gi
    tr, ti = mod(jnp.tanh, ctr, cti)
    htr = or_ * tr - oi * ti
    hti = or_ * ti + oi * tr
    return jnp.stack([htr, hti], -1), jnp.stack([ctr, cti], -1)


def _reference_sequence(x_seq, h0, c0, params):
    h, c = h0, c0
    hs, cs = [], []
    for t in range(x_seq.shape[0]):
        h, c = _reference_cell(x_seq[t], h, c, params)
        hs.append(h)
        cs.append(c)
    return jnp.stack(hs, 0), jnp.stack(cs, 0)


if __name__ == "__main__":
    # 4H = 128 lanes (lane-dense output); T*B = 64 rows for the hoisted GEMM.
    B, INPUT, HIDDEN, T = 8, 32, 32, 8

    key = jax.random.PRNGKey(0)
    kx, kh, kc, kp = jax.random.split(key, 4)
    x_seq = jax.random.normal(kx, (T, B, INPUT, 2), jnp.float32)
    h0 = jax.random.normal(kh, (B, HIDDEN, 2), jnp.float32)
    c0 = jax.random.normal(kc, (B, HIDDEN, 2), jnp.float32)
    params = init_params(kp, INPUT, HIDDEN)

    h1_ref, c1_ref = _reference_cell(x_seq[0], h0, c0, params)
    h_seq_ref, c_seq_ref = _reference_sequence(x_seq, h0, c0, params)

    # ---- single cell (module forward), default f32 path ----
    h1, c1 = complex_lstm_cell(x_seq[0], (h0, c0), params)
    jax.block_until_ready((h1, c1))
    assert h1.shape == (B, HIDDEN, 2) and c1.shape == (B, HIDDEN, 2)
    assert jnp.allclose(h1, h1_ref, atol=2e-2, rtol=2e-2)
    assert jnp.allclose(c1, c1_ref, atol=2e-2, rtol=2e-2)

    # ---- T-step recurrence (f32 recurrence, f32 input projection) ----
    h_seq, c_seq = complex_lstm_sequence(x_seq, h0, c0, params)
    jax.block_until_ready((h_seq, c_seq))
    assert h_seq.shape == (T, B, HIDDEN, 2) and c_seq.shape == (T, B, HIDDEN, 2)
    assert jnp.allclose(h_seq, h_seq_ref, atol=5e-2, rtol=5e-2)
    assert jnp.allclose(c_seq, c_seq_ref, atol=5e-2, rtol=5e-2)

    # ---- bf16 input-projection fast path (recurrence stays f32) ----
    h1b, c1b = complex_lstm_cell(x_seq[0], (h0, c0), params,
                                 matmul_dtype=jnp.bfloat16)
    jax.block_until_ready((h1b, c1b))
    assert jnp.allclose(h1b, h1_ref, atol=3e-2, rtol=3e-2)
    assert jnp.allclose(c1b, c1_ref, atol=3e-2, rtol=3e-2)

    h_seqb, c_seqb = complex_lstm_sequence(x_seq, h0, c0, params,
                                           matmul_dtype=jnp.bfloat16)
    jax.block_until_ready((h_seqb, c_seqb))
    # loose tolerance: bf16 rounding of the input projection compounds over T
    assert jnp.allclose(h_seqb, h_seq_ref, atol=1e-1, rtol=1e-1)
    assert jnp.allclose(c_seqb, c_seq_ref, atol=1e-1, rtol=1e-1)

    print("KERNEL_OK")
</pallas_src>

<mosaic_0001>
module attributes {stable_mosaic.version = 11 : i64} {
  func.func @_input_proj_kernel(%arg0: i32, %arg1: memref<8x64xf32, #tpu.memory_space<vmem>>, %arg2: memref<64x256xf32, #tpu.memory_space<vmem>>, %arg3: memref<1x256xf32, #tpu.memory_space<vmem>>, %arg4: memref<8x256xf32, #tpu.memory_space<vmem>>) attributes {dimension_semantics = [#tpu.dimension_semantics<parallel>], iteration_bounds = array<i64: 1>, scalar_prefetch = 0 : i64, scratch_operands = 0 : i64, tpu.core_type = #tpu.core_type<tc>, window_params = [{transform_indices = @transform_0, window_bounds = array<i64: 8, 64>}, {pipeline_mode = #tpu.pipeline_mode<synchronous>, transform_indices = @transform_1, window_bounds = array<i64: 64, 256>}, {pipeline_mode = #tpu.pipeline_mode<synchronous>, transform_indices = @transform_2, window_bounds = array<i64: 1, 256>}, {transform_indices = @transform_3, window_bounds = array<i64: 8, 256>}]} {
    %c0 = arith.constant 0 : index
    %c0_0 = arith.constant 0 : index
    %0 = vector.load %arg1[%c0, %c0_0] : memref<8x64xf32, #tpu.memory_space<vmem>>, vector<8x64xf32>
    %c0_1 = arith.constant 0 : index
    %c0_2 = arith.constant 0 : index
    %1 = vector.load %arg2[%c0_1, %c0_2] : memref<64x256xf32, #tpu.memory_space<vmem>>, vector<64x256xf32>
    %cst = arith.constant dense<0.000000e+00> : vector<8x256xf32>
    %2 = tpu.matmul %0, %1, %cst {dimension_numbers = #tpu.dot_dimension_numbers<[1], [0], [0], [1], [0, 0, 1, 1], [], []>} : vector<8x64xf32>, vector<64x256xf32>, vector<8x256xf32> -> vector<8x256xf32>
    %c0_3 = arith.constant 0 : index
    %c0_4 = arith.constant 0 : index
    %3 = vector.load %arg3[%c0_3, %c0_4] : memref<1x256xf32, #tpu.memory_space<vmem>>, vector<1x256xf32>
    %4 = vector.broadcast %3 : vector<1x256xf32> to vector<8x256xf32>
    %5 = arith.addf %2, %4 : vector<8x256xf32>
    %c0_5 = arith.constant 0 : index
    %c0_6 = arith.constant 0 : index
    %6 = vector.load %arg4[%c0_5, %c0_6] : memref<8x256xf32, #tpu.memory_space<vmem>>, vector<8x256xf32>
    tpu.vector_store %arg4[%c0_5, %c0_6], %5 {strides = array<i32>} : memref<8x256xf32, #tpu.memory_space<vmem>>, vector<8x256xf32>,
    return
  }
  func.func @transform_0(%arg0: i32) -> (i32, i32) {
    %c0_i32 = arith.constant 0 : i32
    %c0_i32_0 = arith.constant 0 : i32
    return %arg0, %c0_i32 : i32, i32
  }
  func.func @transform_1(%arg0: i32) -> (i32, i32) {
    %c0_i32 = arith.constant 0 : i32
    %c0_i32_0 = arith.constant 0 : i32
    %c0_i32_1 = arith.constant 0 : i32
    return %c0_i32, %c0_i32_0 : i32, i32
  }
  func.func @transform_2(%arg0: i32) -> (i32, i32) {
    %c0_i32 = arith.constant 0 : i32
    %c0_i32_0 = arith.constant 0 : i32
    %c0_i32_1 = arith.constant 0 : i32
    return %c0_i32, %c0_i32_0 : i32, i32
  }
  func.func @transform_3(%arg0: i32) -> (i32, i32) {
    %c0_i32 = arith.constant 0 : i32
    %c0_i32_0 = arith.constant 0 : i32
    return %arg0, %c0_i32 : i32, i32
  }
}

</mosaic_0001>

<bundles_post_ra>
// kernel: tpu_custom_call.1
= control target key start
LH: loop header
LB: loop body
LE: loop exit
PB: predicated region body
PF: predicated region fallthrough
CT: control target
= control target key end

     0   :  { %8 = vsyncpa [#allocation3], 0  ;;  %s274_s0 = inlined_call_operand.hbm [shape: f32[8,64], index: 0, kind: input, shape index: {}]   ;;  %s275_s1 = inlined_call_operand.hbm [shape: f32[64,256], index: 1, kind: input, shape index: {}]   ;;  %s276_s2 = inlined_call_operand.vmem [shape: f32[1,256], index: 2, kind: input, shape index: {}]   ;;  %s277_s3 = inlined_call_operand.hbm [shape: f32[8,256], index: 3, kind: output, shape index: {}]  }
   0x1   :  { %9 = vsyncpa [#allocation6], 0 }
   0x2   :  { %10 = vsyncpa [#allocation4], 0  ;;  %s236_s12 = smov [#allocation2]   ;;  %s237_s14 = smov [#allocation5]  }
   0x3   :  { %s17_s13 = sshll.u32 %s236_s12, 4  ;;  %s26_s15 = sshll.u32 %s237_s14, 4  ;;  %s18_s13 = int_to_ptr.vmem [resolvable:$true] %s17_s13  ;;  %s27_s15 = int_to_ptr.vmem [resolvable:$true] %s26_s15 }
   0x4   :  { %s178_s16 = scalar_lea.vmem %s18_s13, 128  ;;  %p183_p1 = scmp.lt.s32.totalorder %s18_s13, %s18_s13 }
   0x5   :  { %p179_p0 = scmp.ne.s32.totalorder %s18_s13, %s178_s16  ;;  %p184_p2 = scmp.lt.s32.totalorder %s178_s16, %s178_s16 }
   0x7   :  { %p185_p3 = por %p184_p2, %p183_p1 }
   0x9   :  { %p186_p4 = pnand %p185_p3, %p179_p0 }
   0xb   :  { %189 = shalt.err (!%p186_p4)
}
   0xc   :  { %20 = dma.hbm_to_vmem [thread:$0]  %s274_s0, 128, %s18_s13, [#allocation3]  }
   0xd   :  { %s198_s19 = scalar_lea.vmem %s27_s15, 2048  ;;  %p203_p6 = scmp.lt.s32.totalorder %s27_s15, %s27_s15 }
   0xe   :  { %p199_p5 = scmp.ne.s32.totalorder %s27_s15, %s198_s19  ;;  %p204_p7 = scmp.lt.s32.totalorder %s198_s19, %s198_s19 }
  0x10   :  { %p205_p8 = por %p204_p7, %p203_p6 }
  0x12   :  { %p206_p9 = pnand %p205_p8, %p199_p5 }
  0x14   :  { %209 = shalt.err (!%p206_p9)
}
  0x15   :  { %s238_s20 = smov 256   ;;  %s239_s21 = smov 16  }
  0x16   :  { %32 = dma.hbm_to_vmem [thread:$0]  %s275_s1, 2048, %s27_s15, [#allocation6], %s238_s20, %s238_s20, %s239_s21  }
  0x17   :  { %230 = dma.done.wait [#allocation3], 128  }
  0x18   :  { %231 = vsyncadd [#allocation3], 4294967168 }
  0x19   :  { %232 = dma.done.wait [#allocation6], 2048  }
  0x1a   :  { %233 = vsyncadd [#allocation6], 4294965248  ;;  %v240_v0 = vmov 0.0   ;;  %v57_v1 = vld [vmem:[#allocation5 + $0x78] sm:$0xff]  ;;  %v56_v2 = vld [vmem:[#allocation5 + $0x70] sm:$0xff]  ;;  %vm70_vm0 = vcmask 523264   ;;  %v60_v18 = vlaneseq }
  0x1b   :  { %138 = vmatprep.mubr.f32.mxu0 %v240_v0  ;;  %v55_v3 = vld [vmem:[#allocation5 + $0x68] sm:$0xff]  ;;  %90 = vmatprep.subr.mxu0 %v57_v1  ;;  %v54_v4 = vld [vmem:[#allocation5 + $0x60] sm:$0xff]  ;;  %v53_v5 = vld [vmem:[#allocation5 + $0x58] sm:$0xff]  ;;  %s241_s24 = smov [#allocation7]  }
  0x1c   :  { %91 = vmatpush1.msra.mxu0 %v56_v2  ;;  %v52_v6 = vld [vmem:[#allocation5 + $0x50] sm:$0xff]  ;;  %v51_v7 = vld [vmem:[#allocation5 + $0x48] sm:$0xff]  ;;  %v50_v8 = vld [vmem:[#allocation5 + $0x40] sm:$0xff]  ;;  %v61_v19 = vshrl.u32 %v60_v18, 7  ;;  %s153_s25 = sshll.u32 %s241_s24, 4  ;;  %s154_s25 = int_to_ptr.vmem [resolvable:$true] %s153_s25 }
  0x1d   :  { %92 = vmatprep.subr.mxu0 %v55_v3  ;;  %v49_v9 = vld [vmem:[#allocation5 + $0x38] sm:$0xff]  ;;  %v48_v10 = vld [vmem:[#allocation5 + $0x30] sm:$0xff]  ;;  %v47_v11 = vld [vmem:[#allocation5 + $0x28] sm:$0xff]  ;;  %s210_s26 = scalar_lea.vmem %s154_s25, 256  ;;  %p215_p11 = scmp.lt.s32.totalorder %s154_s25, %s154_s25 }
  0x1e   :  { %93 = vmatpush1.msra.mxu0 %v54_v4  ;;  %v46_v12 = vld [vmem:[#allocation5 + $0x20] sm:$0xff]  ;;  %v45_v13 = vld [vmem:[#allocation5 + $0x18] sm:$0xff]  ;;  %v44_v14 = vld [vmem:[#allocation5 + $0x10] sm:$0xff]  ;;  %v62_v20 = vsub.s32 0, %v61_v19  ;;  %v66_v22 = vsub.s32 1, %v61_v19  ;;  %p211_p10 = scmp.ne.s32.totalorder %s154_s25, %s210_s26  ;;  %p216_p12 = scmp.lt.s32.totalorder %s210_s26, %s210_s26 }
  0x1f   :  { %94 = vmatprep.subr.mxu0 %v53_v5  ;;  %v43_v15 = vld [vmem:[#allocation5 + $0x8] sm:$0xff]  ;;  %v42_v16 = vld [vmem:[#allocation5] sm:$0xff]  ;;  %v41_v17 = vld [vmem:[#allocation2] sm:$0xff] }
  0x20   :  { %95 = vmatpush1.msra.mxu0 %v52_v6  ;;  %v58_v21 = vld [vmem:[%s276_s2] sm:$0x3]  ;;  %p217_p13 = por %p216_p12, %p215_p11 }
  0x21   :  { %96 = vmatprep.subr.mxu0 %v51_v7  ;;  %v63_v23 = vrot.slane %v58_v21, %v62_v20  ;;  %v67_v24 = vrot.slane %v58_v21, %v66_v22 }
  0x22   :  { %97 = vmatpush1.msra.mxu0 %v50_v8  ;;  %p218_p0 = pnand %p217_p13, %p211_p10 }
  0x23   :  { %98 = vmatprep.subr.mxu0 %v49_v9 }
  0x24   :  { %99 = vmatpush1.msra.mxu0 %v48_v10 }
  0x25   :  { %100 = vmatprep.subr.mxu0 %v47_v11 }
  0x26   :  { %101 = vmatpush1.msra.mxu0 %v46_v12 }
  0x27   :  { %102 = vmatprep.subr.mxu0 %v45_v13 }
  0x28   :  { %103 = vmatpush1.msra.mxu0 %v44_v14 }
  0x29   :  { %104 = vmatprep.subr.mxu0 %v43_v15 }
  0x2a   :  { %105 = vmatpush1.msra.mxu0 %v42_v16 }
  0x2b   :  { %163 = vmatmul.mubr.msk.f32.vlgmr.msra.gmra.mxu0 %vm70_vm0, %v41_v17 }
  0xeb   :  { %v140_v25 = vpop.f32.mrf.mxu0 }
  0xec   :  { %v141_v26 = vadd.f32 %v140_v25, %v63_v23 }
  0xed   :  { %v142_v27 = vpop.f32.mrf.mxu0 }
  0xee   :  { %145 = vst [vmem:[#allocation7] sm:$0xff] %v141_v26  ;;  %v143_v28 = vadd.f32 %v142_v27, %v67_v24 }
  0xf0   :  { %146 = vst [vmem:[#allocation7 + $0x8] sm:$0xff] %v143_v28 }
  0xf1   :  { %221 = shalt.err (!%p218_p0)
}
  0xf2   :  { %156 = dma.vmem_to_hbm [thread:$0]  %s154_s25, 256, %s277_s3, [#allocation4]  }
  0xf3   :  { %234 = dma.done.wait [#allocation4], 256  }
  0xf4   :  { %235 = vsyncadd [#allocation4], 4294967040 }
  0xf5   :  { %160 = vsyncpa [#allocation3], 1 }
  0xf6   :  { %161 = vsyncpa [#allocation6], 1 }
  0xf7   :  { %162 = vsyncpa [#allocation4], 1 }

</bundles_post_ra>
